<compile_context>
chip_gen: v7x
topology: tpu7x:2x2x1
jax: 0.10.0
libtpu: 0.0.40
codegen_flags: <defaults>
</compile_context>

<pallas_src>
import functools

import jax
import jax.numpy as jnp
from jax.experimental import pallas as pl
from jax.experimental.pallas import tpu as pltpu


# ----------------------------- Pallas kernel --------------------------------

def _lora_mlp_kernel(x_ref, w1t_ref, b1_ref, w2t_ref, b2_ref, y_ref):
    """y = relu(x @ W1eff_t + b1) @ W2eff_t + b2.

    W*eff_t are pre-transposed (din, dout) LoRA-merged weights in bf16; both
    matmuls accumulate in f32 on the MXU; bias-add / ReLU run in f32 on the
    VPU (v5e has no bf16 VALU)."""
    f32 = jnp.float32

    x = x_ref[...].astype(jnp.bfloat16)
    h = jnp.dot(x, w1t_ref[...], preferred_element_type=f32)
    h = jnp.maximum(h + b1_ref[...], 0.0)

    y = jnp.dot(h.astype(jnp.bfloat16), w2t_ref[...], preferred_element_type=f32)
    y_ref[...] = (y + b2_ref[...]).astype(y_ref.dtype)


# ----------------------------- one-time prep --------------------------------

def prepare_lora(params, lora_enabled=True):
    """One-time prep (outside the per-forward hot path).

    Applies the SimpleLora parametrization exactly once:
        W_eff = W + (B @ A).view_as(W) * (1/rank)
    then pre-transposes to K-major and casts to bf16 for the kernel.
    `lora_enabled=False` reproduces LoraApplier.set_enabled(False)."""
    scale = 1.0 / params["rank"]

    def w_eff(W, B, A):
        if not lora_enabled:
            return W
        # torch: matmul(B, A).view_as(W) -- contiguous row-major => reshape.
        return W + (B @ A).reshape(W.shape) * scale

    W1e = w_eff(params["W1"], params["B1"], params["A1"])
    W2e = w_eff(params["W2"], params["B2"], params["A2"])
    return dict(
        W1t=W1e.T.astype(jnp.bfloat16),                      # (d0, d1)
        b1=params["b1"].reshape(1, -1).astype(jnp.float32),  # (1, d1)
        W2t=W2e.T.astype(jnp.bfloat16),                      # (d1, d2)
        b2=params["b2"].reshape(1, -1).astype(jnp.float32),  # (1, d2)
    )


# ----------------------------- forward wrapper ------------------------------

def lora_mlp_forward(prep, x, *, max_batch_tile=256, single_buffer_weights=True):
    """Fused Linear(+LoRA) -> ReLU -> Linear(+LoRA) forward in one pallas_call."""
    batch, d0 = x.shape
    d1 = prep["W1t"].shape[1]
    d2 = prep["W2t"].shape[1]

    # Batch tiling: up to `max_batch_tile` rows per grid step, grid covers the
    # batch with cdiv (ragged last block is masked by Pallas).  Small batches
    # use one full-extent block (no (8,128) divisibility issue).
    tb = batch if batch <= max_batch_tile else max_batch_tile
    grid = (pl.cdiv(batch, tb),)

    # Resident operands (constant block index -> DMA'd once).  Request a
    # single buffer so they are not double-buffered in VMEM.
    pipeline_mode = pl.Buffered(1) if single_buffer_weights else None

    def resident(shape):
        return pl.BlockSpec(shape, lambda i: (0, 0), pipeline_mode=pipeline_mode)

    # TODO(synk): for layers too large to keep resident (v7x: 64 MiB VMEM),
    # add a grid axis tiling d1/d2 instead of full-weight BlockSpecs.

    def nbytes(a):
        return a.size * a.dtype.itemsize

    weight_bytes = (nbytes(prep["W1t"]) + nbytes(prep["W2t"])
                    + nbytes(prep["b1"]) + nbytes(prep["b2"]))
    tile_bytes = tb * (d0 + d1 + d2) * 4                # x tile, h, y tile (f32)
    wbuf = 1 if single_buffer_weights else 2
    needed = wbuf * weight_bytes + 2 * tile_bytes + (2 << 20)
    # Never below the typical scoped default (32 MiB), never above v7x
    # physical VMEM (64 MiB).
    vmem_limit = int(min(max(needed, 32 << 20), 64 << 20))

    cost = pl.CostEstimate(
        flops=2 * batch * (d0 * d1 + d1 * d2),
        transcendentals=0,
        bytes_accessed=batch * (d0 + d2) * 4 + weight_bytes,
    )

    return pl.pallas_call(
        _lora_mlp_kernel,
        out_shape=jax.ShapeDtypeStruct((batch, d2), jnp.float32),
        grid=grid,
        in_specs=[
            pl.BlockSpec((tb, d0), lambda i: (i, 0)),   # x batch tile
            resident(prep["W1t"].shape),
            resident(prep["b1"].shape),
            resident(prep["W2t"].shape),
            resident(prep["b2"].shape),
        ],
        out_specs=pl.BlockSpec((tb, d2), lambda i: (i, 0)),
        compiler_params=pltpu.CompilerParams(
            dimension_semantics=("parallel",),
            vmem_limit_bytes=vmem_limit,
        ),
        cost_estimate=cost,
    )(x, prep["W1t"], prep["b1"], prep["W2t"], prep["b2"])


# ----------------------------- references -----------------------------------

def ref_forward_f32(params, x):
    """Pure-f32 torch-semantics reference (SimpleLora parametrization)."""
    scale = 1.0 / params["rank"]
    W1e = params["W1"] + (params["B1"] @ params["A1"]).reshape(params["W1"].shape) * scale
    W2e = params["W2"] + (params["B2"] @ params["A2"]).reshape(params["W2"].shape) * scale
    h = jnp.maximum(x @ W1e.T + params["b1"], 0.0)
    return h @ W2e.T + params["b2"]


def ref_forward_bf16(prep, x):
    """Reference using the same bf16-stored weights / bf16 dot inputs as the
    kernel (f32 accumulation) -- tight check of the kernel itself."""
    f32 = jnp.float32
    xb = x.astype(jnp.bfloat16).astype(f32)
    h = jnp.maximum(xb @ prep["W1t"].astype(f32) + prep["b1"], 0.0)
    hb = h.astype(jnp.bfloat16).astype(f32)
    return hb @ prep["W2t"].astype(f32) + prep["b2"]


# ----------------------------- main ------------------------------------------

if __name__ == "__main__":
    batch, d0, d1, d2, rank = 8, 128, 256, 128, 2

    key = jax.random.PRNGKey(0)
    ks = jax.random.split(key, 9)

    # Base (frozen) Linear weights, torch convention: weight is (dim_out, dim_in).
    W1 = jax.random.normal(ks[0], (d1, d0), jnp.float32) * 0.05
    b1 = jax.random.normal(ks[1], (d1,), jnp.float32) * 0.05
    W2 = jax.random.normal(ks[2], (d2, d1), jnp.float32) * 0.05
    b2 = jax.random.normal(ks[3], (d2,), jnp.float32) * 0.05

    # SimpleLora params: A (rank, dim_out) ~ N(0,1), B (dim_in, rank).
    # NOTE: PyTorch inits B=0 (delta == 0 at init); use small nonzero B so the
    # LoRA path is actually exercised.
    A1 = jax.random.normal(ks[4], (rank, d1), jnp.float32)
    B1 = jax.random.normal(ks[5], (d0, rank), jnp.float32) * 0.02
    A2 = jax.random.normal(ks[6], (rank, d2), jnp.float32)
    B2 = jax.random.normal(ks[7], (d1, rank), jnp.float32) * 0.02

    x = jax.random.normal(ks[8], (batch, d0), jnp.float32)

    params = dict(W1=W1, b1=b1, A1=A1, B1=B1,
                  W2=W2, b2=b2, A2=A2, B2=B2, rank=rank)

    # One-time prep (LoRA delta folded here), then the single fused kernel.
    prep = prepare_lora(params, lora_enabled=True)

    fwd = jax.jit(functools.partial(lora_mlp_forward, single_buffer_weights=True))
    try:
        y = jax.block_until_ready(fwd(prep, x))
    except Exception:
        # This JAX build may not accept pipeline_mode=pl.Buffered(1) on the
        # top-level pallas_call pipeline; fall back to default double-buffering
        # (identical math, only a larger resident VMEM footprint).
        fwd = jax.jit(functools.partial(lora_mlp_forward, single_buffer_weights=False))
        y = jax.block_until_ready(fwd(prep, x))

    assert y.shape == (batch, d2) and y.dtype == jnp.float32

    # Tight check against a reference that uses the identical bf16-stored
    # weights / bf16 dot inputs (f32 accumulation).
    y_q = ref_forward_bf16(prep, x)
    assert jnp.allclose(y, y_q, atol=1e-3, rtol=1e-3), \
        f"max abs err vs bf16-consistent ref = {jnp.max(jnp.abs(y - y_q))}"

    # Looser sanity check against the pure-f32 torch-semantics reference
    # (difference is only the bf16 weight/activation storage).
    y_f = ref_forward_f32(params, x)
    assert jnp.allclose(y, y_f, atol=2e-2, rtol=2e-2), \
        f"max abs err vs f32 ref = {jnp.max(jnp.abs(y - y_f))}"

    print("KERNEL_OK")
</pallas_src>

<mosaic_0001>
module attributes {stable_mosaic.version = 11 : i64} {
  func.func @_lora_mlp_kernel(%arg0: i32, %arg1: memref<8x128xf32, #tpu.memory_space<vmem>>, %arg2: memref<128x256xbf16, #tpu.memory_space<vmem>>, %arg3: memref<1x256xf32, #tpu.memory_space<vmem>>, %arg4: memref<256x128xbf16, #tpu.memory_space<vmem>>, %arg5: memref<1x128xf32, #tpu.memory_space<vmem>>, %arg6: memref<8x128xf32, #tpu.memory_space<vmem>>) attributes {dimension_semantics = [#tpu.dimension_semantics<parallel>], iteration_bounds = array<i64: 1>, scalar_prefetch = 0 : i64, scratch_operands = 0 : i64, tpu.core_type = #tpu.core_type<tc>, window_params = [{transform_indices = @transform_0, window_bounds = array<i64: 8, 128>}, {pipeline_mode = #tpu.pipeline_mode<synchronous>, transform_indices = @transform_1, window_bounds = array<i64: 128, 256>}, {pipeline_mode = #tpu.pipeline_mode<synchronous>, transform_indices = @transform_2, window_bounds = array<i64: 1, 256>}, {pipeline_mode = #tpu.pipeline_mode<synchronous>, transform_indices = @transform_3, window_bounds = array<i64: 256, 128>}, {pipeline_mode = #tpu.pipeline_mode<synchronous>, transform_indices = @transform_4, window_bounds = array<i64: 1, 128>}, {transform_indices = @transform_5, window_bounds = array<i64: 8, 128>}]} {
    %c0 = arith.constant 0 : index
    %c0_0 = arith.constant 0 : index
    %0 = vector.load %arg1[%c0, %c0_0] : memref<8x128xf32, #tpu.memory_space<vmem>>, vector<8x128xf32>
    %1 = arith.truncf %0 : vector<8x128xf32> to vector<8x128xbf16>
    %c0_1 = arith.constant 0 : index
    %c0_2 = arith.constant 0 : index
    %2 = vector.load %arg2[%c0_1, %c0_2] : memref<128x256xbf16, #tpu.memory_space<vmem>>, vector<128x256xbf16>
    %cst = arith.constant dense<0.000000e+00> : vector<8x256xf32>
    %3 = tpu.matmul %1, %2, %cst {dimension_numbers = #tpu.dot_dimension_numbers<[1], [0], [0], [1], [0, 0, 1, 1], [], []>} : vector<8x128xbf16>, vector<128x256xbf16>, vector<8x256xf32> -> vector<8x256xf32>
    %c0_3 = arith.constant 0 : index
    %c0_4 = arith.constant 0 : index
    %4 = vector.load %arg3[%c0_3, %c0_4] : memref<1x256xf32, #tpu.memory_space<vmem>>, vector<1x256xf32>
    %5 = vector.broadcast %4 : vector<1x256xf32> to vector<8x256xf32>
    %6 = arith.addf %3, %5 : vector<8x256xf32>
    %cst_5 = arith.constant 0.000000e+00 : f32
    %7 = vector.broadcast %cst_5 : f32 to vector<8x256xf32>
    %8 = arith.maximumf %6, %7 : vector<8x256xf32>
    %9 = arith.truncf %8 : vector<8x256xf32> to vector<8x256xbf16>
    %c0_6 = arith.constant 0 : index
    %c0_7 = arith.constant 0 : index
    %10 = vector.load %arg4[%c0_6, %c0_7] : memref<256x128xbf16, #tpu.memory_space<vmem>>, vector<256x128xbf16>
    %cst_8 = arith.constant dense<0.000000e+00> : vector<8x128xf32>
    %11 = tpu.matmul %9, %10, %cst_8 {dimension_numbers = #tpu.dot_dimension_numbers<[1], [0], [0], [1], [0, 0, 1, 1], [], []>} : vector<8x256xbf16>, vector<256x128xbf16>, vector<8x128xf32> -> vector<8x128xf32>
    %c0_9 = arith.constant 0 : index
    %c0_10 = arith.constant 0 : index
    %12 = vector.load %arg5[%c0_9, %c0_10] : memref<1x128xf32, #tpu.memory_space<vmem>>, vector<1x128xf32>
    %13 = vector.broadcast %12 : vector<1x128xf32> to vector<8x128xf32>
    %14 = arith.addf %11, %13 : vector<8x128xf32>
    %c0_11 = arith.constant 0 : index
    %c0_12 = arith.constant 0 : index
    %15 = vector.load %arg6[%c0_11, %c0_12] : memref<8x128xf32, #tpu.memory_space<vmem>>, vector<8x128xf32>
    tpu.vector_store %arg6[%c0_11, %c0_12], %14 {strides = array<i32>} : memref<8x128xf32, #tpu.memory_space<vmem>>, vector<8x128xf32>,
    return
  }
  func.func @transform_0(%arg0: i32) -> (i32, i32) {
    %c0_i32 = arith.constant 0 : i32
    %c0_i32_0 = arith.constant 0 : i32
    return %arg0, %c0_i32 : i32, i32
  }
  func.func @transform_1(%arg0: i32) -> (i32, i32) {
    %c0_i32 = arith.constant 0 : i32
    %c0_i32_0 = arith.constant 0 : i32
    %c0_i32_1 = arith.constant 0 : i32
    return %c0_i32, %c0_i32_0 : i32, i32
  }
  func.func @transform_2(%arg0: i32) -> (i32, i32) {
    %c0_i32 = arith.constant 0 : i32
    %c0_i32_0 = arith.constant 0 : i32
    %c0_i32_1 = arith.constant 0 : i32
    return %c0_i32, %c0_i32_0 : i32, i32
  }
  func.func @transform_3(%arg0: i32) -> (i32, i32) {
    %c0_i32 = arith.constant 0 : i32
    %c0_i32_0 = arith.constant 0 : i32
    %c0_i32_1 = arith.constant 0 : i32
    return %c0_i32, %c0_i32_0 : i32, i32
  }
  func.func @transform_4(%arg0: i32) -> (i32, i32) {
    %c0_i32 = arith.constant 0 : i32
    %c0_i32_0 = arith.constant 0 : i32
    %c0_i32_1 = arith.constant 0 : i32
    return %c0_i32, %c0_i32_0 : i32, i32
  }
  func.func @transform_5(%arg0: i32) -> (i32, i32) {
    %c0_i32 = arith.constant 0 : i32
    %c0_i32_0 = arith.constant 0 : i32
    return %arg0, %c0_i32 : i32, i32
  }
}

module attributes {stable_mosaic.version = 11 : i64} {
  func.func @_lora_mlp_kernel(%arg0: i32, %arg1: memref<8x128xf32, #tpu.memory_space<vmem>>, %arg2: memref<128x256xbf16, #tpu.memory_space<vmem>>, %arg3: memref<1x256xf32, #tpu.memory_space<vmem>>, %arg4: memref<256x128xbf16, #tpu.memory_space<vmem>>, %arg5: memref<1x128xf32, #tpu.memory_space<vmem>>, %arg6: memref<8x128xf32, #tpu.memory_space<vmem>>) attributes {dimension_semantics = [#tpu.dimension_semantics<parallel>], iteration_bounds = array<i64: 1>, scalar_prefetch = 0 : i64, scratch_operands = 0 : i64, tpu.core_type = #tpu.core_type<tc>, window_params = [{transform_indices = @transform_0, window_bounds = array<i64: 8, 128>}, {pipeline_mode = #tpu.pipeline_mode<synchronous>, transform_indices = @transform_1, window_bounds = array<i64: 128, 256>}, {pipeline_mode = #tpu.pipeline_mode<synchronous>, transform_indices = @transform_2, window_bounds = array<i64: 1, 256>}, {pipeline_mode = #tpu.pipeline_mode<synchronous>, transform_indices = @transform_3, window_bounds = array<i64: 256, 128>}, {pipeline_mode = #tpu.pipeline_mode<synchronous>, transform_indices = @transform_4, window_bounds = array<i64: 1, 128>}, {transform_indices = @transform_5, window_bounds = array<i64: 8, 128>}]} {
    %c0 = arith.constant 0 : index
    %c0_0 = arith.constant 0 : index
    %0 = vector.load %arg1[%c0, %c0_0] : memref<8x128xf32, #tpu.memory_space<vmem>>, vector<8x128xf32>
    %1 = arith.truncf %0 : vector<8x128xf32> to vector<8x128xbf16>
    %c0_1 = arith.constant 0 : index
    %c0_2 = arith.constant 0 : index
    %2 = vector.load %arg2[%c0_1, %c0_2] : memref<128x256xbf16, #tpu.memory_space<vmem>>, vector<128x256xbf16>
    %cst = arith.constant dense<0.000000e+00> : vector<8x256xf32>
    %3 = tpu.matmul %1, %2, %cst {dimension_numbers = #tpu.dot_dimension_numbers<[1], [0], [0], [1], [0, 0, 1, 1], [], []>} : vector<8x128xbf16>, vector<128x256xbf16>, vector<8x256xf32> -> vector<8x256xf32>
    %c0_3 = arith.constant 0 : index
    %c0_4 = arith.constant 0 : index
    %4 = vector.load %arg3[%c0_3, %c0_4] : memref<1x256xf32, #tpu.memory_space<vmem>>, vector<1x256xf32>
    %5 = vector.broadcast %4 : vector<1x256xf32> to vector<8x256xf32>
    %6 = arith.addf %3, %5 : vector<8x256xf32>
    %cst_5 = arith.constant 0.000000e+00 : f32
    %7 = vector.broadcast %cst_5 : f32 to vector<8x256xf32>
    %8 = arith.maximumf %6, %7 : vector<8x256xf32>
    %9 = arith.truncf %8 : vector<8x256xf32> to vector<8x256xbf16>
    %c0_6 = arith.constant 0 : index
    %c0_7 = arith.constant 0 : index
    %10 = vector.load %arg4[%c0_6, %c0_7] : memref<256x128xbf16, #tpu.memory_space<vmem>>, vector<256x128xbf16>
    %cst_8 = arith.constant dense<0.000000e+00> : vector<8x128xf32>
    %11 = tpu.matmul %9, %10, %cst_8 {dimension_numbers = #tpu.dot_dimension_numbers<[1], [0], [0], [1], [0, 0, 1, 1], [], []>} : vector<8x256xbf16>, vector<256x128xbf16>, vector<8x128xf32> -> vector<8x128xf32>
    %c0_9 = arith.constant 0 : index
    %c0_10 = arith.constant 0 : index
    %12 = vector.load %arg5[%c0_9, %c0_10] : memref<1x128xf32, #tpu.memory_space<vmem>>, vector<1x128xf32>
    %13 = vector.broadcast %12 : vector<1x128xf32> to vector<8x128xf32>
    %14 = arith.addf %11, %13 : vector<8x128xf32>
    %c0_11 = arith.constant 0 : index
    %c0_12 = arith.constant 0 : index
    %15 = vector.load %arg6[%c0_11, %c0_12] : memref<8x128xf32, #tpu.memory_space<vmem>>, vector<8x128xf32>
    tpu.vector_store %arg6[%c0_11, %c0_12], %14 {strides = array<i32>} : memref<8x128xf32, #tpu.memory_space<vmem>>, vector<8x128xf32>,
    return
  }
  func.func @transform_0(%arg0: i32) -> (i32, i32) {
    %c0_i32 = arith.constant 0 : i32
    %c0_i32_0 = arith.constant 0 : i32
    return %arg0, %c0_i32 : i32, i32
  }
  func.func @transform_1(%arg0: i32) -> (i32, i32) {
    %c0_i32 = arith.constant 0 : i32
    %c0_i32_0 = arith.constant 0 : i32
    %c0_i32_1 = arith.constant 0 : i32
    return %c0_i32, %c0_i32_0 : i32, i32
  }
  func.func @transform_2(%arg0: i32) -> (i32, i32) {
    %c0_i32 = arith.constant 0 : i32
    %c0_i32_0 = arith.constant 0 : i32
    %c0_i32_1 = arith.constant 0 : i32
    return %c0_i32, %c0_i32_0 : i32, i32
  }
  func.func @transform_3(%arg0: i32) -> (i32, i32) {
    %c0_i32 = arith.constant 0 : i32
    %c0_i32_0 = arith.constant 0 : i32
    %c0_i32_1 = arith.constant 0 : i32
    return %c0_i32, %c0_i32_0 : i32, i32
  }
  func.func @transform_4(%arg0: i32) -> (i32, i32) {
    %c0_i32 = arith.constant 0 : i32
    %c0_i32_0 = arith.constant 0 : i32
    %c0_i32_1 = arith.constant 0 : i32
    return %c0_i32, %c0_i32_0 : i32, i32
  }
  func.func @transform_5(%arg0: i32) -> (i32, i32) {
    %c0_i32 = arith.constant 0 : i32
    %c0_i32_0 = arith.constant 0 : i32
    return %arg0, %c0_i32 : i32, i32
  }
}

</mosaic_0001>

<bundles_post_ra>
// kernel: lora_mlp_forward.1
= control target key start
LH: loop header
LB: loop body
LE: loop exit
PB: predicated region body
PF: predicated region fallthrough
CT: control target
= control target key end

     0   :  { %10 = vsyncpa [#allocation3], 0  ;;  %s655_s0 = inlined_call_operand.vmem [shape: f32[8,128], index: 0, kind: input, shape index: {}]   ;;  %s656_s1 = inlined_call_operand.hbm [shape: bf16[128,256], index: 1, kind: input, shape index: {}]   ;;  %s657_s2 = inlined_call_operand.vmem [shape: f32[1,256], index: 2, kind: input, shape index: {}]   ;;  %s658_s3 = inlined_call_operand.hbm [shape: bf16[256,128], index: 3, kind: input, shape index: {}]   ;;  %s659_s4 = inlined_call_operand.vmem [shape: f32[1,128], index: 4, kind: input, shape index: {}]   ;;  %s660_s5 = inlined_call_operand.hbm [shape: f32[8,128], index: 5, kind: output, shape index: {}]  }
   0x1   :  { %11 = vsyncpa [#allocation6], 0 }
   0x2   :  { %12 = vsyncpa [#allocation4], 0  ;;  %s572_s18 = smov [#allocation2]   ;;  %s500_s22 = scalar_lea.hbm %s656_s1, 2048 }
   0x3   :  { %s20_s19 = sshll.u32 %s572_s18, 4  ;;  %p501_p0 = scmp.ne.s32.totalorder %s656_s1, %s500_s22  ;;  %s21_s19 = int_to_ptr.vmem [resolvable:$true] %s20_s19 }
   0x4   :  { %p504_p1 = scmp.lt.u32.totalorder %s500_s22, %s656_s1 }
   0x6   :  { %p506_p2 = pnand %p504_p1, %p501_p0 }
   0x8   :  { %509 = shalt.err (!%p506_p2)
}
   0x9   :  { %s510_s27 = scalar_lea.vmem %s21_s19, 2048  ;;  %p515_p4 = scmp.lt.s32.totalorder %s21_s19, %s21_s19 }
   0xa   :  { %p511_p3 = scmp.ne.s32.totalorder %s21_s19, %s510_s27  ;;  %p516_p5 = scmp.lt.s32.totalorder %s510_s27, %s510_s27 }
   0xc   :  { %p517_p6 = por %p516_p5, %p515_p4 }
   0xe   :  { %p518_p7 = pnand %p517_p6, %p511_p3 }
  0x10   :  { %521 = shalt.err (!%p518_p7)
}
  0x11   :  { %s573_s28 = smov 128   ;;  %s574_s29 = smov 8  }
  0x12   :  { %26 = dma.hbm_to_vmem [thread:$0]  %s656_s1, 2048, %s21_s19, [#allocation3], %s573_s28, %s573_s28, %s574_s29  }
  0x13   :  { %s575_s7 = smov [#allocation5]   ;;  %s522_s11 = scalar_lea.hbm %s658_s3, 2048 }
  0x14   :  { %s34_s8 = sshll.u32 %s575_s7, 4  ;;  %p523_p8 = scmp.ne.s32.totalorder %s658_s3, %s522_s11  ;;  %s35_s8 = int_to_ptr.vmem [resolvable:$true] %s34_s8 }
  0x15   :  { %p526_p9 = scmp.lt.u32.totalorder %s522_s11, %s658_s3 }
  0x17   :  { %p528_p10 = pnand %p526_p9, %p523_p8 }
  0x19   :  { %531 = shalt.err (!%p528_p10)
}
  0x1a   :  { %s532_s16 = scalar_lea.vmem %s35_s8, 2048  ;;  %p537_p12 = scmp.lt.s32.totalorder %s35_s8, %s35_s8 }
  0x1b   :  { %p533_p11 = scmp.ne.s32.totalorder %s35_s8, %s532_s16  ;;  %p538_p13 = scmp.lt.s32.totalorder %s532_s16, %s532_s16 }
  0x1d   :  { %p539_p0 = por %p538_p13, %p537_p12 }
  0x1f   :  { %p540_p1 = pnand %p539_p0, %p533_p11 }
  0x21   :  { %543 = shalt.err (!%p540_p1)
}
  0x22   :  { %s576_s1 = smov 64   ;;  %s577_s17 = smov 4  }
  0x23   :  { %40 = dma.hbm_to_vmem [thread:$0]  %s658_s3, 2048, %s35_s8, [#allocation6], %s576_s1, %s576_s1, %s577_s17  }
  0x24   :  { %566 = dma.done.wait [#allocation3], 2048  }
  0x25   :  { %567 = vsyncadd [#allocation3], 4294965248 }
  0x26   :  { %568 = dma.done.wait [#allocation6], 2048  }
  0x27   :  { %569 = vsyncadd [#allocation6], 4294965248  ;;  %v578_v0 = vmov 0   ;;  %v460_v1 = vld [vmem:[#allocation2 + $0x4] ss:$8 sps:$4 sm:$0xff]   ;;  %v488_v15 = vld [vmem:[#allocation5 + $0x50] sm:$0xff]   ;;  %v70_v35 = vlaneseq }
  0x28   :  { %192 = vmatprep.mubr.bf16.mxu0 %v578_v0  ;;  %v462_v2 = vld [vmem:[#allocation2] ss:$8 sps:$4 sm:$0xff]   ;;  %160 = vmatprep.subr.bf16.mxu0 %v460_v1  ;;  %v463_v3 = vld [vmem:[#allocation2 + $0x14] ss:$8 sps:$4 sm:$0xff]   ;;  %v465_v4 = vld [vmem:[#allocation2 + $0x10] ss:$8 sps:$4 sm:$0xff]  }
  0x29   :  { %161 = vmatpush1.bf16.msra.mxu0 %v462_v2  ;;  %v466_v5 = vld [vmem:[#allocation2 + $0x24] ss:$8 sps:$4 sm:$0xff]   ;;  %v468_v6 = vld [vmem:[#allocation2 + $0x20] ss:$8 sps:$4 sm:$0xff]   ;;  %v469_v7 = vld [vmem:[#allocation2 + $0x34] ss:$8 sps:$4 sm:$0xff]  }
  0x2a   :  { %162 = vmatprep.subr.bf16.mxu0 %v463_v3  ;;  %v471_v8 = vld [vmem:[#allocation2 + $0x30] ss:$8 sps:$4 sm:$0xff]   ;;  %v472_v9 = vld [vmem:[#allocation2 + $0x44] ss:$8 sps:$4 sm:$0xff]   ;;  %v474_v12 = vld [vmem:[#allocation2 + $0x40] ss:$8 sps:$4 sm:$0xff]  }
  0x2b   :  { %v484_v10 = vld [vmem:[#allocation5 + $0x40] sm:$0xff]   ;;  %v486_v13 = vld [vmem:[#allocation5 + $0x48] sm:$0xff]   ;;  %v475_v16 = vld [vmem:[#allocation2 + $0x54] ss:$8 sps:$4 sm:$0xff]   ;;  %v71_v36 = vshrl.u32 %v70_v35, 7 }
  0x2c   :  { %v485_v11 = vld [vmem:[#allocation5] sm:$0xff]   ;;  %430 = vmatprep.subr.bf16.mxu1 %v484_v10  ;;  %v487_v14 = vld [vmem:[#allocation5 + $0x8] sm:$0xff]   ;;  %v477_v17 = vld [vmem:[#allocation2 + $0x50] ss:$8 sps:$4 sm:$0xff]  }
  0x2d   :  { %163 = vmatpush1.bf16.msra.mxu0 %v465_v4  ;;  %431 = vmatpush3.bf16.msra.mxu1 %v485_v11  ;;  %v489_v18 = vld [vmem:[#allocation5 + $0x10] sm:$0xff]   ;;  %v490_v19 = vld [vmem:[#allocation5 + $0x58] sm:$0xff]   ;;  %v478_v20 = vld [vmem:[#allocation2 + $0x64] ss:$8 sps:$4 sm:$0xff]   ;;  %v72_v37 = vsub.s32 0, %v71_v36  ;;  %v76_v39 = vsub.s32 1, %v71_v36 }
  0x2e   :  { %164 = vmatprep.subr.bf16.mxu0 %v466_v5  ;;  %432 = vmatprep.subr.bf16.mxu1 %v486_v13  ;;  %v480_v21 = vld [vmem:[#allocation2 + $0x60] ss:$8 sps:$4 sm:$0xff]   ;;  %v481_v22 = vld [vmem:[#allocation2 + $0x74] ss:$8 sps:$4 sm:$0xff]   ;;  %v483_v26 = vld [vmem:[#allocation2 + $0x70] ss:$8 sps:$4 sm:$0xff]  }
  0x2f   :  { %v491_v23 = vld [vmem:[#allocation5 + $0x18] sm:$0xff]   ;;  %v492_v24 = vld [vmem:[#allocation5 + $0x60] sm:$0xff]   ;;  %v494_v28 = vld [vmem:[#allocation5 + $0x68] sm:$0xff]  }
  0x30   :  { %v493_v25 = vld [vmem:[#allocation5 + $0x20] sm:$0xff]   ;;  %v495_v30 = vld [vmem:[#allocation5 + $0x28] sm:$0xff]   ;;  %v496_v31 = vld [vmem:[#allocation5 + $0x70] sm:$0xff]  }
  0x31   :  { %165 = vmatpush1.bf16.msra.mxu0 %v468_v6  ;;  %433 = vmatpush3.bf16.msra.mxu1 %v487_v14  ;;  %v50_v27 = vld [vmem:[%s655_s0] sm:$0xff]  ;;  %v497_v32 = vld [vmem:[#allocation5 + $0x30] sm:$0xff]   ;;  %v498_v33 = vld [vmem:[#allocation5 + $0x78] sm:$0xff]  }
  0x32   :  { %166 = vmatprep.subr.bf16.mxu0 %v469_v7  ;;  %434 = vmatprep.subr.bf16.mxu1 %v488_v15  ;;  %v51_v29 = vpack.c.bf16 %v50_v27, %v50_v27  ;;  %v499_v34 = vld [vmem:[#allocation5 + $0x38] sm:$0xff]   ;;  %v68_v38 = vld [vmem:[%s657_s2] sm:$0x3]  ;;  %s579_s2 = smov [#allocation7]  }
  0x33   :  { %v73_v40 = vrot.slane %v68_v38, %v72_v37  ;;  %v77_v41 = vrot.slane %v68_v38, %v76_v39  ;;  %v413_v53 = vld [vmem:[%s659_s4] ss:$0 sm:$0xff]  ;;  %s387_s24 = sshll.u32 %s579_s2, 4  ;;  %s388_s24 = int_to_ptr.vmem [resolvable:$true] %s387_s24 }
  0x34   :  { %s544_s25 = scalar_lea.vmem %s388_s24, 128  ;;  %p549_p3 = scmp.lt.s32.totalorder %s388_s24, %s388_s24 }
  0x35   :  { %167 = vmatpush1.bf16.msra.mxu0 %v471_v8  ;;  %435 = vmatpush3.bf16.msra.mxu1 %v489_v18  ;;  %p545_p2 = scmp.ne.s32.totalorder %s388_s24, %s544_s25  ;;  %p550_p4 = scmp.lt.s32.totalorder %s544_s25, %s544_s25 }
  0x36   :  { %168 = vmatprep.subr.bf16.mxu0 %v472_v9  ;;  %436 = vmatprep.subr.bf16.mxu1 %v490_v19 }
  0x37   :  { %p551_p5 = por %p550_p4, %p549_p3 }
  0x39   :  { %169 = vmatpush1.bf16.msra.mxu0 %v474_v12  ;;  %437 = vmatpush3.bf16.msra.mxu1 %v491_v23  ;;  %p552_p6 = pnand %p551_p5, %p545_p2 }
  0x3a   :  { %170 = vmatprep.subr.bf16.mxu0 %v475_v16  ;;  %438 = vmatprep.subr.bf16.mxu1 %v492_v24 }
  0x3d   :  { %171 = vmatpush1.bf16.msra.mxu0 %v477_v17  ;;  %439 = vmatpush3.bf16.msra.mxu1 %v493_v25 }
  0x3e   :  { %172 = vmatprep.subr.bf16.mxu0 %v478_v20  ;;  %440 = vmatprep.subr.bf16.mxu1 %v494_v28 }
  0x41   :  { %173 = vmatpush1.bf16.msra.mxu0 %v480_v21  ;;  %441 = vmatpush3.bf16.msra.mxu1 %v495_v30 }
  0x42   :  { %174 = vmatprep.subr.bf16.mxu0 %v481_v22  ;;  %442 = vmatprep.subr.bf16.mxu1 %v496_v31 }
  0x45   :  { %175 = vmatpush1.bf16.msra.mxu0 %v483_v26  ;;  %443 = vmatpush3.bf16.msra.mxu1 %v497_v32 }
  0x46   :  { %444 = vmatprep.subr.bf16.mxu1 %v498_v33 }
  0x48   :  { %193 = vmatmul.mubr.bf16.vlgmr.msra.gmra.mrb[0].mxu0 %v51_v29 }
  0x49   :  { %445 = vmatpush3.bf16.msra.mxu1 %v499_v34 }
 0x11b   :  { %v194_v42 = vpop.f32.mrb[0].mxu0 }
 0x11c   :  { %v195_v43 = vadd.f32 %v194_v42, %v73_v40  ;;  %v196_v44 = vpop.f32.mrb[1].mxu0 }
 0x11d   :  { %v197_v45 = vadd.f32 %v196_v44, %v77_v41  ;;  %v198_v46 = vpop.f32.mrb[2].mxu0 }
 0x11e   :  { %v201_v47 = vmax.f32 %v195_v43, 0.0  ;;  %v199_v48 = vpop.f32.mrb[3].mxu0 }
 0x11f   :  { %v202_v49 = vmax.f32 %v197_v45, 0.0 }
 0x120   :  { %v203_v51 = vpack.c.bf16 %v201_v47, %v201_v47 }
 0x121   :  { %v204_v50 = vpack.c.bf16 %v202_v49, %v202_v49 }
 0x123   :  { %372 = vmatprep.mubr.bf16.mxu1 %v204_v50 }
 0x124   :  { %373 = vmatmul.mubr.bf16.vlgmr.msra.gmra.mrb[0].mxu1 %v203_v51 }
 0x1f7   :  { %v446_v52 = vpop.f32.mrb[0].mxu1 }
 0x1f8   :  { %v447_v54 = vpop.f32.mrb[1].mxu1 }
 0x1f9   :  { %v448_v55 = vadd.f32 %v447_v54, %v446_v52  ;;  %v449_v56 = vpop.f32.mrb[2].mxu1 }
 0x1fa   :  { %v450_v57 = vpop.f32.mrb[3].mxu1 }
 0x1fb   :  { %v375_v58 = vadd.f32 %v448_v55, %v413_v53 }
 0x1fd   :  { %380 = vst [vmem:[#allocation7] sm:$0xff] %v375_v58 }
 0x1fe   :  { %555 = shalt.err (!%p552_p6)
}
 0x1ff   :  { %s556_s4 = scalar_lea.hbm %s660_s5, 128 }
 0x200   :  { %p557_p7 = scmp.ne.s32.totalorder %s660_s5, %s556_s4  ;;  %p560_p8 = scmp.lt.u32.totalorder %s556_s4, %s660_s5 }
 0x202   :  { %p562_p9 = pnand %p560_p8, %p557_p7 }
 0x204   :  { %565 = shalt.err (!%p562_p9)
}
 0x205   :  { %390 = dma.vmem_to_hbm [thread:$0]  %s388_s24, 128, %s660_s5, [#allocation4]  }
 0x206   :  { %570 = dma.done.wait [#allocation4], 128  }
 0x207   :  { %571 = vsyncadd [#allocation4], 4294967168 }
 0x208   :  { %394 = vsyncpa [#allocation3], 1 }
 0x209   :  { %395 = vsyncpa [#allocation6], 1 }
 0x20a   :  { %396 = vsyncpa [#allocation4], 1 }

// kernel: lora_mlp_forward.1
= control target key start
LH: loop header
LB: loop body
LE: loop exit
PB: predicated region body
PF: predicated region fallthrough
CT: control target
= control target key end

     0   :  { %10 = vsyncpa [#allocation3], 0  ;;  %s655_s0 = inlined_call_operand.vmem [shape: f32[8,128], index: 0, kind: input, shape index: {}]   ;;  %s656_s1 = inlined_call_operand.hbm [shape: bf16[128,256], index: 1, kind: input, shape index: {}]   ;;  %s657_s2 = inlined_call_operand.vmem [shape: f32[1,256], index: 2, kind: input, shape index: {}]   ;;  %s658_s3 = inlined_call_operand.hbm [shape: bf16[256,128], index: 3, kind: input, shape index: {}]   ;;  %s659_s4 = inlined_call_operand.vmem [shape: f32[1,128], index: 4, kind: input, shape index: {}]   ;;  %s660_s5 = inlined_call_operand.hbm [shape: f32[8,128], index: 5, kind: output, shape index: {}]  }
   0x1   :  { %11 = vsyncpa [#allocation6], 0 }
   0x2   :  { %12 = vsyncpa [#allocation4], 0  ;;  %s572_s18 = smov [#allocation2]   ;;  %s500_s22 = scalar_lea.hbm %s656_s1, 2048 }
   0x3   :  { %s20_s19 = sshll.u32 %s572_s18, 4  ;;  %p501_p0 = scmp.ne.s32.totalorder %s656_s1, %s500_s22  ;;  %s21_s19 = int_to_ptr.vmem [resolvable:$true] %s20_s19 }
   0x4   :  { %p504_p1 = scmp.lt.u32.totalorder %s500_s22, %s656_s1 }
   0x6   :  { %p506_p2 = pnand %p504_p1, %p501_p0 }
   0x8   :  { %509 = shalt.err (!%p506_p2)
}
   0x9   :  { %s510_s27 = scalar_lea.vmem %s21_s19, 2048  ;;  %p515_p4 = scmp.lt.s32.totalorder %s21_s19, %s21_s19 }
   0xa   :  { %p511_p3 = scmp.ne.s32.totalorder %s21_s19, %s510_s27  ;;  %p516_p5 = scmp.lt.s32.totalorder %s510_s27, %s510_s27 }
   0xc   :  { %p517_p6 = por %p516_p5, %p515_p4 }
   0xe   :  { %p518_p7 = pnand %p517_p6, %p511_p3 }
  0x10   :  { %521 = shalt.err (!%p518_p7)
}
  0x11   :  { %s573_s28 = smov 128   ;;  %s574_s29 = smov 8  }
  0x12   :  { %26 = dma.hbm_to_vmem [thread:$0]  %s656_s1, 2048, %s21_s19, [#allocation3], %s573_s28, %s573_s28, %s574_s29  }
  0x13   :  { %s575_s7 = smov [#allocation5]   ;;  %s522_s11 = scalar_lea.hbm %s658_s3, 2048 }
  0x14   :  { %s34_s8 = sshll.u32 %s575_s7, 4  ;;  %p523_p8 = scmp.ne.s32.totalorder %s658_s3, %s522_s11  ;;  %s35_s8 = int_to_ptr.vmem [resolvable:$true] %s34_s8 }
  0x15   :  { %p526_p9 = scmp.lt.u32.totalorder %s522_s11, %s658_s3 }
  0x17   :  { %p528_p10 = pnand %p526_p9, %p523_p8 }
  0x19   :  { %531 = shalt.err (!%p528_p10)
}
  0x1a   :  { %s532_s16 = scalar_lea.vmem %s35_s8, 2048  ;;  %p537_p12 = scmp.lt.s32.totalorder %s35_s8, %s35_s8 }
  0x1b   :  { %p533_p11 = scmp.ne.s32.totalorder %s35_s8, %s532_s16  ;;  %p538_p13 = scmp.lt.s32.totalorder %s532_s16, %s532_s16 }
  0x1d   :  { %p539_p0 = por %p538_p13, %p537_p12 }
  0x1f   :  { %p540_p1 = pnand %p539_p0, %p533_p11 }
  0x21   :  { %543 = shalt.err (!%p540_p1)
}
  0x22   :  { %s576_s1 = smov 64   ;;  %s577_s17 = smov 4  }
  0x23   :  { %40 = dma.hbm_to_vmem [thread:$0]  %s658_s3, 2048, %s35_s8, [#allocation6], %s576_s1, %s576_s1, %s577_s17  }
  0x24   :  { %566 = dma.done.wait [#allocation3], 2048  }
  0x25   :  { %567 = vsyncadd [#allocation3], 4294965248 }
  0x26   :  { %568 = dma.done.wait [#allocation6], 2048  }
  0x27   :  { %569 = vsyncadd [#allocation6], 4294965248  ;;  %v578_v0 = vmov 0   ;;  %v460_v1 = vld [vmem:[#allocation2 + $0x4] ss:$8 sps:$4 sm:$0xff]   ;;  %v488_v15 = vld [vmem:[#allocation5 + $0x50] sm:$0xff]   ;;  %v70_v35 = vlaneseq }
  0x28   :  { %192 = vmatprep.mubr.bf16.mxu0 %v578_v0  ;;  %v462_v2 = vld [vmem:[#allocation2] ss:$8 sps:$4 sm:$0xff]   ;;  %160 = vmatprep.subr.bf16.mxu0 %v460_v1  ;;  %v463_v3 = vld [vmem:[#allocation2 + $0x14] ss:$8 sps:$4 sm:$0xff]   ;;  %v465_v4 = vld [vmem:[#allocation2 + $0x10] ss:$8 sps:$4 sm:$0xff]  }
  0x29   :  { %161 = vmatpush1.bf16.msra.mxu0 %v462_v2  ;;  %v466_v5 = vld [vmem:[#allocation2 + $0x24] ss:$8 sps:$4 sm:$0xff]   ;;  %v468_v6 = vld [vmem:[#allocation2 + $0x20] ss:$8 sps:$4 sm:$0xff]   ;;  %v469_v7 = vld [vmem:[#allocation2 + $0x34] ss:$8 sps:$4 sm:$0xff]  }
  0x2a   :  { %162 = vmatprep.subr.bf16.mxu0 %v463_v3  ;;  %v471_v8 = vld [vmem:[#allocation2 + $0x30] ss:$8 sps:$4 sm:$0xff]   ;;  %v472_v9 = vld [vmem:[#allocation2 + $0x44] ss:$8 sps:$4 sm:$0xff]   ;;  %v474_v12 = vld [vmem:[#allocation2 + $0x40] ss:$8 sps:$4 sm:$0xff]  }
  0x2b   :  { %v484_v10 = vld [vmem:[#allocation5 + $0x40] sm:$0xff]   ;;  %v486_v13 = vld [vmem:[#allocation5 + $0x48] sm:$0xff]   ;;  %v475_v16 = vld [vmem:[#allocation2 + $0x54] ss:$8 sps:$4 sm:$0xff]   ;;  %v71_v36 = vshrl.u32 %v70_v35, 7 }
  0x2c   :  { %v485_v11 = vld [vmem:[#allocation5] sm:$0xff]   ;;  %430 = vmatprep.subr.bf16.mxu1 %v484_v10  ;;  %v487_v14 = vld [vmem:[#allocation5 + $0x8] sm:$0xff]   ;;  %v477_v17 = vld [vmem:[#allocation2 + $0x50] ss:$8 sps:$4 sm:$0xff]  }
  0x2d   :  { %163 = vmatpush1.bf16.msra.mxu0 %v465_v4  ;;  %431 = vmatpush3.bf16.msra.mxu1 %v485_v11  ;;  %v489_v18 = vld [vmem:[#allocation5 + $0x10] sm:$0xff]   ;;  %v490_v19 = vld [vmem:[#allocation5 + $0x58] sm:$0xff]   ;;  %v478_v20 = vld [vmem:[#allocation2 + $0x64] ss:$8 sps:$4 sm:$0xff]   ;;  %v72_v37 = vsub.s32 0, %v71_v36  ;;  %v76_v39 = vsub.s32 1, %v71_v36 }
  0x2e   :  { %164 = vmatprep.subr.bf16.mxu0 %v466_v5  ;;  %432 = vmatprep.subr.bf16.mxu1 %v486_v13  ;;  %v480_v21 = vld [vmem:[#allocation2 + $0x60] ss:$8 sps:$4 sm:$0xff]   ;;  %v481_v22 = vld [vmem:[#allocation2 + $0x74] ss:$8 sps:$4 sm:$0xff]   ;;  %v483_v26 = vld [vmem:[#allocation2 + $0x70] ss:$8 sps:$4 sm:$0xff]  }
  0x2f   :  { %v491_v23 = vld [vmem:[#allocation5 + $0x18] sm:$0xff]   ;;  %v492_v24 = vld [vmem:[#allocation5 + $0x60] sm:$0xff]   ;;  %v494_v28 = vld [vmem:[#allocation5 + $0x68] sm:$0xff]  }
  0x30   :  { %v493_v25 = vld [vmem:[#allocation5 + $0x20] sm:$0xff]   ;;  %v495_v30 = vld [vmem:[#allocation5 + $0x28] sm:$0xff]   ;;  %v496_v31 = vld [vmem:[#allocation5 + $0x70] sm:$0xff]  }
  0x31   :  { %165 = vmatpush1.bf16.msra.mxu0 %v468_v6  ;;  %433 = vmatpush3.bf16.msra.mxu1 %v487_v14  ;;  %v50_v27 = vld [vmem:[%s655_s0] sm:$0xff]  ;;  %v497_v32 = vld [vmem:[#allocation5 + $0x30] sm:$0xff]   ;;  %v498_v33 = vld [vmem:[#allocation5 + $0x78] sm:$0xff]  }
  0x32   :  { %166 = vmatprep.subr.bf16.mxu0 %v469_v7  ;;  %434 = vmatprep.subr.bf16.mxu1 %v488_v15  ;;  %v51_v29 = vpack.c.bf16 %v50_v27, %v50_v27  ;;  %v499_v34 = vld [vmem:[#allocation5 + $0x38] sm:$0xff]   ;;  %v68_v38 = vld [vmem:[%s657_s2] sm:$0x3]  ;;  %s579_s2 = smov [#allocation7]  }
  0x33   :  { %v73_v40 = vrot.slane %v68_v38, %v72_v37  ;;  %v77_v41 = vrot.slane %v68_v38, %v76_v39  ;;  %v413_v53 = vld [vmem:[%s659_s4] ss:$0 sm:$0xff]  ;;  %s387_s24 = sshll.u32 %s579_s2, 4  ;;  %s388_s24 = int_to_ptr.vmem [resolvable:$true] %s387_s24 }
  0x34   :  { %s544_s25 = scalar_lea.vmem %s388_s24, 128  ;;  %p549_p3 = scmp.lt.s32.totalorder %s388_s24, %s388_s24 }
  0x35   :  { %167 = vmatpush1.bf16.msra.mxu0 %v471_v8  ;;  %435 = vmatpush3.bf16.msra.mxu1 %v489_v18  ;;  %p545_p2 = scmp.ne.s32.totalorder %s388_s24, %s544_s25  ;;  %p550_p4 = scmp.lt.s32.totalorder %s544_s25, %s544_s25 }
  0x36   :  { %168 = vmatprep.subr.bf16.mxu0 %v472_v9  ;;  %436 = vmatprep.subr.bf16.mxu1 %v490_v19 }
  0x37   :  { %p551_p5 = por %p550_p4, %p549_p3 }
  0x39   :  { %169 = vmatpush1.bf16.msra.mxu0 %v474_v12  ;;  %437 = vmatpush3.bf16.msra.mxu1 %v491_v23  ;;  %p552_p6 = pnand %p551_p5, %p545_p2 }
  0x3a   :  { %170 = vmatprep.subr.bf16.mxu0 %v475_v16  ;;  %438 = vmatprep.subr.bf16.mxu1 %v492_v24 }
  0x3d   :  { %171 = vmatpush1.bf16.msra.mxu0 %v477_v17  ;;  %439 = vmatpush3.bf16.msra.mxu1 %v493_v25 }
  0x3e   :  { %172 = vmatprep.subr.bf16.mxu0 %v478_v20  ;;  %440 = vmatprep.subr.bf16.mxu1 %v494_v28 }
  0x41   :  { %173 = vmatpush1.bf16.msra.mxu0 %v480_v21  ;;  %441 = vmatpush3.bf16.msra.mxu1 %v495_v30 }
  0x42   :  { %174 = vmatprep.subr.bf16.mxu0 %v481_v22  ;;  %442 = vmatprep.subr.bf16.mxu1 %v496_v31 }
  0x45   :  { %175 = vmatpush1.bf16.msra.mxu0 %v483_v26  ;;  %443 = vmatpush3.bf16.msra.mxu1 %v497_v32 }
  0x46   :  { %444 = vmatprep.subr.bf16.mxu1 %v498_v33 }
  0x48   :  { %193 = vmatmul.mubr.bf16.vlgmr.msra.gmra.mrb[0].mxu0 %v51_v29 }
  0x49   :  { %445 = vmatpush3.bf16.msra.mxu1 %v499_v34 }
 0x11b   :  { %v194_v42 = vpop.f32.mrb[0].mxu0 }
 0x11c   :  { %v195_v43 = vadd.f32 %v194_v42, %v73_v40  ;;  %v196_v44 = vpop.f32.mrb[1].mxu0 }
 0x11d   :  { %v197_v45 = vadd.f32 %v196_v44, %v77_v41  ;;  %v198_v46 = vpop.f32.mrb[2].mxu0 }
 0x11e   :  { %v201_v47 = vmax.f32 %v195_v43, 0.0  ;;  %v199_v48 = vpop.f32.mrb[3].mxu0 }
 0x11f   :  { %v202_v49 = vmax.f32 %v197_v45, 0.0 }
 0x120   :  { %v203_v51 = vpack.c.bf16 %v201_v47, %v201_v47 }
 0x121   :  { %v204_v50 = vpack.c.bf16 %v202_v49, %v202_v49 }
 0x123   :  { %372 = vmatprep.mubr.bf16.mxu1 %v204_v50 }
 0x124   :  { %373 = vmatmul.mubr.bf16.vlgmr.msra.gmra.mrb[0].mxu1 %v203_v51 }
 0x1f7   :  { %v446_v52 = vpop.f32.mrb[0].mxu1 }
 0x1f8   :  { %v447_v54 = vpop.f32.mrb[1].mxu1 }
 0x1f9   :  { %v448_v55 = vadd.f32 %v447_v54, %v446_v52  ;;  %v449_v56 = vpop.f32.mrb[2].mxu1 }
 0x1fa   :  { %v450_v57 = vpop.f32.mrb[3].mxu1 }
 0x1fb   :  { %v375_v58 = vadd.f32 %v448_v55, %v413_v53 }
 0x1fd   :  { %380 = vst [vmem:[#allocation7] sm:$0xff] %v375_v58 }
 0x1fe   :  { %555 = shalt.err (!%p552_p6)
}
 0x1ff   :  { %s556_s4 = scalar_lea.hbm %s660_s5, 128 }
 0x200   :  { %p557_p7 = scmp.ne.s32.totalorder %s660_s5, %s556_s4  ;;  %p560_p8 = scmp.lt.u32.totalorder %s556_s4, %s660_s5 }
 0x202   :  { %p562_p9 = pnand %p560_p8, %p557_p7 }
 0x204   :  { %565 = shalt.err (!%p562_p9)
}
 0x205   :  { %390 = dma.vmem_to_hbm [thread:$0]  %s388_s24, 128, %s660_s5, [#allocation4]  }
 0x206   :  { %570 = dma.done.wait [#allocation4], 128  }
 0x207   :  { %571 = vsyncadd [#allocation4], 4294967168 }
 0x208   :  { %394 = vsyncpa [#allocation3], 1 }
 0x209   :  { %395 = vsyncpa [#allocation6], 1 }
 0x20a   :  { %396 = vsyncpa [#allocation4], 1 }

</bundles_post_ra>
